<compile_context>
chip_gen: v6e
topology: v6e:2x2x1
jax: 0.10.0
libtpu: 0.0.40
codegen_flags: <defaults>
</compile_context>

<pallas_src>
import functools

import jax
import jax.numpy as jnp
from jax.experimental import pallas as pl
from jax.experimental.pallas import tpu as pltpu


def _round_up(x, m):
    return (x + m - 1) // m * m


# ---------------------------------------------------------------------------
# Kernel body: fused 4-layer MLP (encoder + decoder).
# ---------------------------------------------------------------------------
def autoencoder_kernel(x_ref,
                       w1_ref, b1_ref, w2_ref, b2_ref,
                       w3_ref, b3_ref, w4_ref, b4_ref,
                       xx_ref, emb_ref):
    """4x (bf16 matmul -> f32 bias add -> ReLU); emits reconstruction + embeddings."""
    x = x_ref[...]

    # encoder: Linear(d_in, d_hid) -> ReLU -> Linear(d_hid, d_out) -> ReLU
    h1 = jnp.dot(x, w1_ref[...], preferred_element_type=jnp.float32) + b1_ref[...]
    h1 = jnp.maximum(h1, 0.0).astype(w2_ref.dtype)

    emb_f32 = jnp.dot(h1, w2_ref[...], preferred_element_type=jnp.float32) + b2_ref[...]
    emb_f32 = jnp.maximum(emb_f32, 0.0)
    emb_lo = emb_f32.astype(w3_ref.dtype)

    # decoder: Linear(d_out, d_hid) -> ReLU -> Linear(d_hid, d_in) -> ReLU
    h3 = jnp.dot(emb_lo, w3_ref[...], preferred_element_type=jnp.float32) + b3_ref[...]
    h3 = jnp.maximum(h3, 0.0).astype(w4_ref.dtype)

    xx = jnp.dot(h3, w4_ref[...], preferred_element_type=jnp.float32) + b4_ref[...]
    xx = jnp.maximum(xx, 0.0)

    emb_ref[...] = emb_f32.astype(emb_ref.dtype)
    xx_ref[...] = xx.astype(xx_ref.dtype)


# ---------------------------------------------------------------------------
# Generation-aware tiling defaults.
# ---------------------------------------------------------------------------
@functools.lru_cache(maxsize=1)
def _tiling_config():
    """Pick (tm cap, min grid steps, vmem limit) from the TPU generation.

    v7x: 64 MiB VMEM per TensorCore, 2 TCs -> leave headroom below the
    physical ceiling and make sure there are >= 2 "parallel" grid steps so
    both cores get work. v5e / v6e: 128 MiB VMEM, single TC -> bigger batch
    tiles, fewer grid steps (amortize ~0.35 us/step pipeline overhead).
    Unknown hardware falls back to the conservative (v7x-safe) settings.
    """
    vmem_bytes = None
    try:
        vmem_bytes = int(pltpu.get_tpu_info().vmem_capacity_bytes)
    except Exception:
        pass
    if vmem_bytes is not None and vmem_bytes > 64 * 1024 * 1024:
        # v5e / v6e class: 128 MiB VMEM, one TensorCore.
        return {"tm_cap": 512, "min_grid_steps": 1,
                "vmem_limit": 96 * 1024 * 1024}
    # v7x class (or unknown): 64 MiB VMEM per TC, two TensorCores.
    return {"tm_cap": 256, "min_grid_steps": 2,
            "vmem_limit": 48 * 1024 * 1024}


# ---------------------------------------------------------------------------
# Forward (whole thing under one jit: pad -> pallas_call -> slice).
# ---------------------------------------------------------------------------
def _forward_impl(x, params, *, d_in, d_out, tm, out_dtype, vmem_limit,
                  single_buffer_weights):
    B = x.shape[0]
    w1p, b1p, w2p, b2p, w3p, b3p, w4p, b4p = params
    d_in_p, d_hid_p = w1p.shape
    d_out_p = w2p.shape[1]

    # Zero padding is semantics-preserving: padded input/hidden lanes carry 0,
    # padded weight rows are 0, padded biases are 0 (ReLU(0) = 0). Padded
    # batch rows produce ReLU(bias) garbage that is sliced off before return.
    B_p = _round_up(B, tm)
    xp = jnp.pad(x, ((0, B_p - B), (0, d_in_p - x.shape[1])))

    grid = (B_p // tm,)
    full = lambda i: (0, 0)  # weights/biases: whole array, grid-invariant

    if single_buffer_weights:
        # Grid-invariant blocks: single-buffer them (DMA'd once, never change).
        def wspec(shape):
            return pl.BlockSpec(shape, full, pipeline_mode=pl.Buffered(1))
    else:
        def wspec(shape):
            return pl.BlockSpec(shape, full)

    # Advisory cost estimate: 4 matmuls, weights + IO traffic (weights once).
    flops = 4 * B_p * (d_in_p * d_hid_p + d_hid_p * d_out_p)
    weight_bytes = sum(int(a.size) * a.dtype.itemsize
                       for a in (w1p, b1p, w2p, b2p, w3p, b3p, w4p, b4p))
    io_bytes = (int(xp.size) * xp.dtype.itemsize
                + B_p * (d_in_p + d_out_p) * jnp.dtype(out_dtype).itemsize)
    cost = pl.CostEstimate(flops=int(flops), transcendentals=0,
                           bytes_accessed=int(weight_bytes + io_bytes))

    xx_p, emb_p = pl.pallas_call(
        autoencoder_kernel,
        out_shape=(
            jax.ShapeDtypeStruct((B_p, d_in_p), out_dtype),
            jax.ShapeDtypeStruct((B_p, d_out_p), out_dtype),
        ),
        grid_spec=pltpu.PrefetchScalarGridSpec(
            num_scalar_prefetch=0,
            grid=grid,
            in_specs=[
                pl.BlockSpec((tm, d_in_p), lambda i: (i, 0)),   # x batch tile
                wspec((d_in_p, d_hid_p)),                       # W1
                wspec((1, d_hid_p)),                            # b1
                wspec((d_hid_p, d_out_p)),                      # W2
                wspec((1, d_out_p)),                            # b2
                wspec((d_out_p, d_hid_p)),                      # W3
                wspec((1, d_hid_p)),                            # b3
                wspec((d_hid_p, d_in_p)),                       # W4
                wspec((1, d_in_p)),                             # b4
            ],
            out_specs=[
                pl.BlockSpec((tm, d_in_p), lambda i: (i, 0)),   # xx
                pl.BlockSpec((tm, d_out_p), lambda i: (i, 0)),  # embeddings
            ],
        ),
        compiler_params=pltpu.CompilerParams(
            dimension_semantics=("parallel",),
            vmem_limit_bytes=vmem_limit,
        ),
        cost_estimate=cost,
    )(xp, w1p, b1p, w2p, b2p, w3p, b3p, w4p, b4p)

    # Slice padded outputs back to the logical shapes (fused by XLA under jit).
    return xx_p[:B, :d_in], emb_p[:B, :d_out]


_forward_jit = jax.jit(
    _forward_impl,
    static_argnames=("d_in", "d_out", "tm", "out_dtype", "vmem_limit",
                     "single_buffer_weights"),
)


def autoencoder_forward(x, params, *, d_in, d_out, tm=None,
                        out_dtype=jnp.bfloat16):
    """Fused autoencoder forward.

    Returns (reconstruction xx, embeddings), matching the PyTorch module:
    forward() returns xx; embeddings correspond to self.embeddings.

    params must come from init_params (pre-padded to lane multiples of 128).
    tm: batch tile override; by default chosen generation-aware (see
    _tiling_config): larger tiles on v5e/v6e, >= 2 grid steps on v7x.
    """
    cfg = _tiling_config()
    B = x.shape[0]
    sublane = 16 if x.dtype == jnp.bfloat16 else 8
    if tm is None:
        tm = min(_round_up(B, sublane), cfg["tm_cap"])
        if cfg["min_grid_steps"] > 1:
            # Split the batch so both TensorCores (v7x) get a grid step,
            # as long as the batch is big enough to split on sublane tiles.
            rounded = _round_up(B, sublane)
            split = _round_up(-(-rounded // cfg["min_grid_steps"]), sublane)
            tm = max(min(tm, split), sublane)
    tm = _round_up(tm, sublane)

    kwargs = dict(d_in=d_in, d_out=d_out, tm=tm, out_dtype=out_dtype,
                  vmem_limit=cfg["vmem_limit"])
    try:
        return _forward_jit(x, params, single_buffer_weights=True, **kwargs)
    except Exception:
        # pl.Buffered(1) not supported on this jax/libtpu combo: fall back to
        # the default double-buffered pipeline (identical numerics).
        return _forward_jit(x, params, single_buffer_weights=False, **kwargs)


# ---------------------------------------------------------------------------
# Parameter init: padded ONCE here (model-load time), never per forward call.
# ---------------------------------------------------------------------------
def init_params(key, d_in, d_hid, d_out, w_dtype=jnp.bfloat16):
    """Deterministic init. Weights stored [in, out] (transposed vs PyTorch),
    bf16, lane-padded to multiples of 128; biases [1, out] f32, lane-padded."""
    d_in_p = _round_up(d_in, 128)
    d_hid_p = _round_up(d_hid, 128)
    d_out_p = _round_up(d_out, 128)
    ks = jax.random.split(key, 8)

    def lin(kw, kb, fan_in, fan_out, fan_in_p, fan_out_p):
        bound = 1.0 / jnp.sqrt(jnp.float32(fan_in))
        w = jax.random.uniform(kw, (fan_in, fan_out), jnp.float32, -bound, bound)
        b = jax.random.uniform(kb, (1, fan_out), jnp.float32, -bound, bound)
        w = jnp.pad(w, ((0, fan_in_p - fan_in), (0, fan_out_p - fan_out)))
        b = jnp.pad(b, ((0, 0), (0, fan_out_p - fan_out)))
        return w.astype(w_dtype), b

    w1, b1 = lin(ks[0], ks[1], d_in, d_hid, d_in_p, d_hid_p)
    w2, b2 = lin(ks[2], ks[3], d_hid, d_out, d_hid_p, d_out_p)
    w3, b3 = lin(ks[4], ks[5], d_out, d_hid, d_out_p, d_hid_p)
    w4, b4 = lin(ks[6], ks[7], d_hid, d_in, d_hid_p, d_in_p)
    return (w1, b1, w2, b2, w3, b3, w4, b4)


def reference_forward(x, params, d_in, d_out):
    """Pure-JAX reference mirroring the kernel's bf16-matmul / f32-accumulate
    math (operates on the padded params; padding is zero-preserving)."""
    w1, b1, w2, b2, w3, b3, w4, b4 = params
    cdt = w1.dtype
    d_in_p = w1.shape[0]
    xp = jnp.pad(x, ((0, 0), (0, d_in_p - x.shape[1])))

    def layer(a, w, b):
        y = jnp.dot(a.astype(cdt), w, preferred_element_type=jnp.float32) + b
        return jnp.maximum(y, 0.0)

    h1 = layer(xp, w1, b1)
    emb = layer(h1, w2, b2)
    h3 = layer(emb, w3, b3)
    xx = layer(h3, w4, b4)
    return xx[:, :d_in], emb[:, :d_out]


if __name__ == "__main__":
    # Small shapes consistent with the module (original: d_in=2000, d_hid=800,
    # d_out=100). Deliberately non-multiples of 128 to exercise lane padding,
    # and a batch big enough to exercise the multi-step grid path on v7x.
    B, d_in, d_hid, d_out = 48, 200, 96, 40

    key = jax.random.PRNGKey(0)
    kx, kp = jax.random.split(key)
    x = jax.random.normal(kx, (B, d_in), dtype=jnp.float32).astype(jnp.bfloat16)
    params = init_params(kp, d_in, d_hid, d_out)

    xx, emb = autoencoder_forward(x, params, d_in=d_in, d_out=d_out)
    xx = jax.block_until_ready(xx)
    emb = jax.block_until_ready(emb)

    xx_ref, emb_ref = reference_forward(x, params, d_in, d_out)
    assert xx.shape == (B, d_in) and emb.shape == (B, d_out)
    assert jnp.allclose(xx.astype(jnp.float32), xx_ref, atol=2e-2, rtol=2e-2)
    assert jnp.allclose(emb.astype(jnp.float32), emb_ref, atol=2e-2, rtol=2e-2)

    print("KERNEL_OK")
</pallas_src>

<mosaic_0001>
module attributes {stable_mosaic.version = 11 : i64} {
  func.func @autoencoder_kernel(%arg0: i32, %arg1: memref<32x256xbf16, #tpu.memory_space<vmem>>, %arg2: memref<256x128xbf16, #tpu.memory_space<vmem>>, %arg3: memref<1x128xf32, #tpu.memory_space<vmem>>, %arg4: memref<128x128xbf16, #tpu.memory_space<vmem>>, %arg5: memref<1x128xf32, #tpu.memory_space<vmem>>, %arg6: memref<128x128xbf16, #tpu.memory_space<vmem>>, %arg7: memref<1x128xf32, #tpu.memory_space<vmem>>, %arg8: memref<128x256xbf16, #tpu.memory_space<vmem>>, %arg9: memref<1x256xf32, #tpu.memory_space<vmem>>, %arg10: memref<32x256xbf16, #tpu.memory_space<vmem>>, %arg11: memref<32x128xbf16, #tpu.memory_space<vmem>>) attributes {dimension_semantics = [#tpu.dimension_semantics<parallel>], iteration_bounds = array<i64: 2>, scalar_prefetch = 0 : i64, scratch_operands = 0 : i64, tpu.core_type = #tpu.core_type<tc>, window_params = [{transform_indices = @transform_0, window_bounds = array<i64: 32, 256>}, {pipeline_mode = #tpu.pipeline_mode<synchronous>, transform_indices = @transform_1, window_bounds = array<i64: 256, 128>}, {pipeline_mode = #tpu.pipeline_mode<synchronous>, transform_indices = @transform_2, window_bounds = array<i64: 1, 128>}, {pipeline_mode = #tpu.pipeline_mode<synchronous>, transform_indices = @transform_3, window_bounds = array<i64: 128, 128>}, {pipeline_mode = #tpu.pipeline_mode<synchronous>, transform_indices = @transform_4, window_bounds = array<i64: 1, 128>}, {pipeline_mode = #tpu.pipeline_mode<synchronous>, transform_indices = @transform_5, window_bounds = array<i64: 128, 128>}, {pipeline_mode = #tpu.pipeline_mode<synchronous>, transform_indices = @transform_6, window_bounds = array<i64: 1, 128>}, {pipeline_mode = #tpu.pipeline_mode<synchronous>, transform_indices = @transform_7, window_bounds = array<i64: 128, 256>}, {pipeline_mode = #tpu.pipeline_mode<synchronous>, transform_indices = @transform_8, window_bounds = array<i64: 1, 256>}, {transform_indices = @transform_9, window_bounds = array<i64: 32, 256>}, {transform_indices = @transform_10, window_bounds = array<i64: 32, 128>}]} {
    %c0 = arith.constant 0 : index
    %c0_0 = arith.constant 0 : index
    %0 = vector.load %arg1[%c0, %c0_0] : memref<32x256xbf16, #tpu.memory_space<vmem>>, vector<32x256xbf16>
    %c0_1 = arith.constant 0 : index
    %c0_2 = arith.constant 0 : index
    %1 = vector.load %arg2[%c0_1, %c0_2] : memref<256x128xbf16, #tpu.memory_space<vmem>>, vector<256x128xbf16>
    %cst = arith.constant dense<0.000000e+00> : vector<32x128xf32>
    %2 = tpu.matmul %0, %1, %cst {dimension_numbers = #tpu.dot_dimension_numbers<[1], [0], [0], [1], [0, 0, 1, 1], [], []>} : vector<32x256xbf16>, vector<256x128xbf16>, vector<32x128xf32> -> vector<32x128xf32>
    %c0_3 = arith.constant 0 : index
    %c0_4 = arith.constant 0 : index
    %3 = vector.load %arg3[%c0_3, %c0_4] : memref<1x128xf32, #tpu.memory_space<vmem>>, vector<1x128xf32>
    %4 = vector.broadcast %3 : vector<1x128xf32> to vector<32x128xf32>
    %5 = arith.addf %2, %4 : vector<32x128xf32>
    %cst_5 = arith.constant 0.000000e+00 : f32
    %6 = vector.broadcast %cst_5 : f32 to vector<32x128xf32>
    %7 = arith.maximumf %5, %6 : vector<32x128xf32>
    %8 = arith.truncf %7 : vector<32x128xf32> to vector<32x128xbf16>
    %c0_6 = arith.constant 0 : index
    %c0_7 = arith.constant 0 : index
    %9 = vector.load %arg4[%c0_6, %c0_7] : memref<128x128xbf16, #tpu.memory_space<vmem>>, vector<128x128xbf16>
    %cst_8 = arith.constant dense<0.000000e+00> : vector<32x128xf32>
    %10 = tpu.matmul %8, %9, %cst_8 {dimension_numbers = #tpu.dot_dimension_numbers<[1], [0], [0], [1], [0, 0, 1, 1], [], []>} : vector<32x128xbf16>, vector<128x128xbf16>, vector<32x128xf32> -> vector<32x128xf32>
    %c0_9 = arith.constant 0 : index
    %c0_10 = arith.constant 0 : index
    %11 = vector.load %arg5[%c0_9, %c0_10] : memref<1x128xf32, #tpu.memory_space<vmem>>, vector<1x128xf32>
    %12 = vector.broadcast %11 : vector<1x128xf32> to vector<32x128xf32>
    %13 = arith.addf %10, %12 : vector<32x128xf32>
    %cst_11 = arith.constant 0.000000e+00 : f32
    %14 = vector.broadcast %cst_11 : f32 to vector<32x128xf32>
    %15 = arith.maximumf %13, %14 : vector<32x128xf32>
    %16 = arith.truncf %15 : vector<32x128xf32> to vector<32x128xbf16>
    %c0_12 = arith.constant 0 : index
    %c0_13 = arith.constant 0 : index
    %17 = vector.load %arg6[%c0_12, %c0_13] : memref<128x128xbf16, #tpu.memory_space<vmem>>, vector<128x128xbf16>
    %cst_14 = arith.constant dense<0.000000e+00> : vector<32x128xf32>
    %18 = tpu.matmul %16, %17, %cst_14 {dimension_numbers = #tpu.dot_dimension_numbers<[1], [0], [0], [1], [0, 0, 1, 1], [], []>} : vector<32x128xbf16>, vector<128x128xbf16>, vector<32x128xf32> -> vector<32x128xf32>
    %c0_15 = arith.constant 0 : index
    %c0_16 = arith.constant 0 : index
    %19 = vector.load %arg7[%c0_15, %c0_16] : memref<1x128xf32, #tpu.memory_space<vmem>>, vector<1x128xf32>
    %20 = vector.broadcast %19 : vector<1x128xf32> to vector<32x128xf32>
    %21 = arith.addf %18, %20 : vector<32x128xf32>
    %cst_17 = arith.constant 0.000000e+00 : f32
    %22 = vector.broadcast %cst_17 : f32 to vector<32x128xf32>
    %23 = arith.maximumf %21, %22 : vector<32x128xf32>
    %24 = arith.truncf %23 : vector<32x128xf32> to vector<32x128xbf16>
    %c0_18 = arith.constant 0 : index
    %c0_19 = arith.constant 0 : index
    %25 = vector.load %arg8[%c0_18, %c0_19] : memref<128x256xbf16, #tpu.memory_space<vmem>>, vector<128x256xbf16>
    %cst_20 = arith.constant dense<0.000000e+00> : vector<32x256xf32>
    %26 = tpu.matmul %24, %25, %cst_20 {dimension_numbers = #tpu.dot_dimension_numbers<[1], [0], [0], [1], [0, 0, 1, 1], [], []>} : vector<32x128xbf16>, vector<128x256xbf16>, vector<32x256xf32> -> vector<32x256xf32>
    %c0_21 = arith.constant 0 : index
    %c0_22 = arith.constant 0 : index
    %27 = vector.load %arg9[%c0_21, %c0_22] : memref<1x256xf32, #tpu.memory_space<vmem>>, vector<1x256xf32>
    %28 = vector.broadcast %27 : vector<1x256xf32> to vector<32x256xf32>
    %29 = arith.addf %26, %28 : vector<32x256xf32>
    %cst_23 = arith.constant 0.000000e+00 : f32
    %30 = vector.broadcast %cst_23 : f32 to vector<32x256xf32>
    %31 = arith.maximumf %29, %30 : vector<32x256xf32>
    %32 = arith.truncf %15 : vector<32x128xf32> to vector<32x128xbf16>
    %c0_24 = arith.constant 0 : index
    %c0_25 = arith.constant 0 : index
    %33 = vector.load %arg11[%c0_24, %c0_25] : memref<32x128xbf16, #tpu.memory_space<vmem>>, vector<32x128xbf16>
    tpu.vector_store %arg11[%c0_24, %c0_25], %32 {strides = array<i32>} : memref<32x128xbf16, #tpu.memory_space<vmem>>, vector<32x128xbf16>,
    %34 = arith.truncf %31 : vector<32x256xf32> to vector<32x256xbf16>
    %c0_26 = arith.constant 0 : index
    %c0_27 = arith.constant 0 : index
    %35 = vector.load %arg10[%c0_26, %c0_27] : memref<32x256xbf16, #tpu.memory_space<vmem>>, vector<32x256xbf16>
    tpu.vector_store %arg10[%c0_26, %c0_27], %34 {strides = array<i32>} : memref<32x256xbf16, #tpu.memory_space<vmem>>, vector<32x256xbf16>,
    return
  }
  func.func @transform_0(%arg0: i32) -> (i32, i32) {
    %c0_i32 = arith.constant 0 : i32
    %c0_i32_0 = arith.constant 0 : i32
    return %arg0, %c0_i32 : i32, i32
  }
  func.func @transform_1(%arg0: i32) -> (i32, i32) {
    %c0_i32 = arith.constant 0 : i32
    %c0_i32_0 = arith.constant 0 : i32
    %c0_i32_1 = arith.constant 0 : i32
    return %c0_i32, %c0_i32_0 : i32, i32
  }
  func.func @transform_2(%arg0: i32) -> (i32, i32) {
    %c0_i32 = arith.constant 0 : i32
    %c0_i32_0 = arith.constant 0 : i32
    %c0_i32_1 = arith.constant 0 : i32
    return %c0_i32, %c0_i32_0 : i32, i32
  }
  func.func @transform_3(%arg0: i32) -> (i32, i32) {
    %c0_i32 = arith.constant 0 : i32
    %c0_i32_0 = arith.constant 0 : i32
    %c0_i32_1 = arith.constant 0 : i32
    return %c0_i32, %c0_i32_0 : i32, i32
  }
  func.func @transform_4(%arg0: i32) -> (i32, i32) {
    %c0_i32 = arith.constant 0 : i32
    %c0_i32_0 = arith.constant 0 : i32
    %c0_i32_1 = arith.constant 0 : i32
    return %c0_i32, %c0_i32_0 : i32, i32
  }
  func.func @transform_5(%arg0: i32) -> (i32, i32) {
    %c0_i32 = arith.constant 0 : i32
    %c0_i32_0 = arith.constant 0 : i32
    %c0_i32_1 = arith.constant 0 : i32
    return %c0_i32, %c0_i32_0 : i32, i32
  }
  func.func @transform_6(%arg0: i32) -> (i32, i32) {
    %c0_i32 = arith.constant 0 : i32
    %c0_i32_0 = arith.constant 0 : i32
    %c0_i32_1 = arith.constant 0 : i32
    return %c0_i32, %c0_i32_0 : i32, i32
  }
  func.func @transform_7(%arg0: i32) -> (i32, i32) {
    %c0_i32 = arith.constant 0 : i32
    %c0_i32_0 = arith.constant 0 : i32
    %c0_i32_1 = arith.constant 0 : i32
    return %c0_i32, %c0_i32_0 : i32, i32
  }
  func.func @transform_8(%arg0: i32) -> (i32, i32) {
    %c0_i32 = arith.constant 0 : i32
    %c0_i32_0 = arith.constant 0 : i32
    %c0_i32_1 = arith.constant 0 : i32
    return %c0_i32, %c0_i32_0 : i32, i32
  }
  func.func @transform_9(%arg0: i32) -> (i32, i32) {
    %c0_i32 = arith.constant 0 : i32
    %c0_i32_0 = arith.constant 0 : i32
    return %arg0, %c0_i32 : i32, i32
  }
  func.func @transform_10(%arg0: i32) -> (i32, i32) {
    %c0_i32 = arith.constant 0 : i32
    %c0_i32_0 = arith.constant 0 : i32
    return %arg0, %c0_i32 : i32, i32
  }
}

module attributes {stable_mosaic.version = 11 : i64} {
  func.func @autoencoder_kernel(%arg0: i32, %arg1: memref<32x256xbf16, #tpu.memory_space<vmem>>, %arg2: memref<256x128xbf16, #tpu.memory_space<vmem>>, %arg3: memref<1x128xf32, #tpu.memory_space<vmem>>, %arg4: memref<128x128xbf16, #tpu.memory_space<vmem>>, %arg5: memref<1x128xf32, #tpu.memory_space<vmem>>, %arg6: memref<128x128xbf16, #tpu.memory_space<vmem>>, %arg7: memref<1x128xf32, #tpu.memory_space<vmem>>, %arg8: memref<128x256xbf16, #tpu.memory_space<vmem>>, %arg9: memref<1x256xf32, #tpu.memory_space<vmem>>, %arg10: memref<32x256xbf16, #tpu.memory_space<vmem>>, %arg11: memref<32x128xbf16, #tpu.memory_space<vmem>>) attributes {dimension_semantics = [#tpu.dimension_semantics<parallel>], iteration_bounds = array<i64: 2>, scalar_prefetch = 0 : i64, scratch_operands = 0 : i64, tpu.core_type = #tpu.core_type<tc>, window_params = [{transform_indices = @transform_0, window_bounds = array<i64: 32, 256>}, {pipeline_mode = #tpu.pipeline_mode<synchronous>, transform_indices = @transform_1, window_bounds = array<i64: 256, 128>}, {pipeline_mode = #tpu.pipeline_mode<synchronous>, transform_indices = @transform_2, window_bounds = array<i64: 1, 128>}, {pipeline_mode = #tpu.pipeline_mode<synchronous>, transform_indices = @transform_3, window_bounds = array<i64: 128, 128>}, {pipeline_mode = #tpu.pipeline_mode<synchronous>, transform_indices = @transform_4, window_bounds = array<i64: 1, 128>}, {pipeline_mode = #tpu.pipeline_mode<synchronous>, transform_indices = @transform_5, window_bounds = array<i64: 128, 128>}, {pipeline_mode = #tpu.pipeline_mode<synchronous>, transform_indices = @transform_6, window_bounds = array<i64: 1, 128>}, {pipeline_mode = #tpu.pipeline_mode<synchronous>, transform_indices = @transform_7, window_bounds = array<i64: 128, 256>}, {pipeline_mode = #tpu.pipeline_mode<synchronous>, transform_indices = @transform_8, window_bounds = array<i64: 1, 256>}, {transform_indices = @transform_9, window_bounds = array<i64: 32, 256>}, {transform_indices = @transform_10, window_bounds = array<i64: 32, 128>}]} {
    %c0 = arith.constant 0 : index
    %c0_0 = arith.constant 0 : index
    %0 = vector.load %arg1[%c0, %c0_0] : memref<32x256xbf16, #tpu.memory_space<vmem>>, vector<32x256xbf16>
    %c0_1 = arith.constant 0 : index
    %c0_2 = arith.constant 0 : index
    %1 = vector.load %arg2[%c0_1, %c0_2] : memref<256x128xbf16, #tpu.memory_space<vmem>>, vector<256x128xbf16>
    %cst = arith.constant dense<0.000000e+00> : vector<32x128xf32>
    %2 = tpu.matmul %0, %1, %cst {dimension_numbers = #tpu.dot_dimension_numbers<[1], [0], [0], [1], [0, 0, 1, 1], [], []>} : vector<32x256xbf16>, vector<256x128xbf16>, vector<32x128xf32> -> vector<32x128xf32>
    %c0_3 = arith.constant 0 : index
    %c0_4 = arith.constant 0 : index
    %3 = vector.load %arg3[%c0_3, %c0_4] : memref<1x128xf32, #tpu.memory_space<vmem>>, vector<1x128xf32>
    %4 = vector.broadcast %3 : vector<1x128xf32> to vector<32x128xf32>
    %5 = arith.addf %2, %4 : vector<32x128xf32>
    %cst_5 = arith.constant 0.000000e+00 : f32
    %6 = vector.broadcast %cst_5 : f32 to vector<32x128xf32>
    %7 = arith.maximumf %5, %6 : vector<32x128xf32>
    %8 = arith.truncf %7 : vector<32x128xf32> to vector<32x128xbf16>
    %c0_6 = arith.constant 0 : index
    %c0_7 = arith.constant 0 : index
    %9 = vector.load %arg4[%c0_6, %c0_7] : memref<128x128xbf16, #tpu.memory_space<vmem>>, vector<128x128xbf16>
    %cst_8 = arith.constant dense<0.000000e+00> : vector<32x128xf32>
    %10 = tpu.matmul %8, %9, %cst_8 {dimension_numbers = #tpu.dot_dimension_numbers<[1], [0], [0], [1], [0, 0, 1, 1], [], []>} : vector<32x128xbf16>, vector<128x128xbf16>, vector<32x128xf32> -> vector<32x128xf32>
    %c0_9 = arith.constant 0 : index
    %c0_10 = arith.constant 0 : index
    %11 = vector.load %arg5[%c0_9, %c0_10] : memref<1x128xf32, #tpu.memory_space<vmem>>, vector<1x128xf32>
    %12 = vector.broadcast %11 : vector<1x128xf32> to vector<32x128xf32>
    %13 = arith.addf %10, %12 : vector<32x128xf32>
    %cst_11 = arith.constant 0.000000e+00 : f32
    %14 = vector.broadcast %cst_11 : f32 to vector<32x128xf32>
    %15 = arith.maximumf %13, %14 : vector<32x128xf32>
    %16 = arith.truncf %15 : vector<32x128xf32> to vector<32x128xbf16>
    %c0_12 = arith.constant 0 : index
    %c0_13 = arith.constant 0 : index
    %17 = vector.load %arg6[%c0_12, %c0_13] : memref<128x128xbf16, #tpu.memory_space<vmem>>, vector<128x128xbf16>
    %cst_14 = arith.constant dense<0.000000e+00> : vector<32x128xf32>
    %18 = tpu.matmul %16, %17, %cst_14 {dimension_numbers = #tpu.dot_dimension_numbers<[1], [0], [0], [1], [0, 0, 1, 1], [], []>} : vector<32x128xbf16>, vector<128x128xbf16>, vector<32x128xf32> -> vector<32x128xf32>
    %c0_15 = arith.constant 0 : index
    %c0_16 = arith.constant 0 : index
    %19 = vector.load %arg7[%c0_15, %c0_16] : memref<1x128xf32, #tpu.memory_space<vmem>>, vector<1x128xf32>
    %20 = vector.broadcast %19 : vector<1x128xf32> to vector<32x128xf32>
    %21 = arith.addf %18, %20 : vector<32x128xf32>
    %cst_17 = arith.constant 0.000000e+00 : f32
    %22 = vector.broadcast %cst_17 : f32 to vector<32x128xf32>
    %23 = arith.maximumf %21, %22 : vector<32x128xf32>
    %24 = arith.truncf %23 : vector<32x128xf32> to vector<32x128xbf16>
    %c0_18 = arith.constant 0 : index
    %c0_19 = arith.constant 0 : index
    %25 = vector.load %arg8[%c0_18, %c0_19] : memref<128x256xbf16, #tpu.memory_space<vmem>>, vector<128x256xbf16>
    %cst_20 = arith.constant dense<0.000000e+00> : vector<32x256xf32>
    %26 = tpu.matmul %24, %25, %cst_20 {dimension_numbers = #tpu.dot_dimension_numbers<[1], [0], [0], [1], [0, 0, 1, 1], [], []>} : vector<32x128xbf16>, vector<128x256xbf16>, vector<32x256xf32> -> vector<32x256xf32>
    %c0_21 = arith.constant 0 : index
    %c0_22 = arith.constant 0 : index
    %27 = vector.load %arg9[%c0_21, %c0_22] : memref<1x256xf32, #tpu.memory_space<vmem>>, vector<1x256xf32>
    %28 = vector.broadcast %27 : vector<1x256xf32> to vector<32x256xf32>
    %29 = arith.addf %26, %28 : vector<32x256xf32>
    %cst_23 = arith.constant 0.000000e+00 : f32
    %30 = vector.broadcast %cst_23 : f32 to vector<32x256xf32>
    %31 = arith.maximumf %29, %30 : vector<32x256xf32>
    %32 = arith.truncf %15 : vector<32x128xf32> to vector<32x128xbf16>
    %c0_24 = arith.constant 0 : index
    %c0_25 = arith.constant 0 : index
    %33 = vector.load %arg11[%c0_24, %c0_25] : memref<32x128xbf16, #tpu.memory_space<vmem>>, vector<32x128xbf16>
    tpu.vector_store %arg11[%c0_24, %c0_25], %32 {strides = array<i32>} : memref<32x128xbf16, #tpu.memory_space<vmem>>, vector<32x128xbf16>,
    %34 = arith.truncf %31 : vector<32x256xf32> to vector<32x256xbf16>
    %c0_26 = arith.constant 0 : index
    %c0_27 = arith.constant 0 : index
    %35 = vector.load %arg10[%c0_26, %c0_27] : memref<32x256xbf16, #tpu.memory_space<vmem>>, vector<32x256xbf16>
    tpu.vector_store %arg10[%c0_26, %c0_27], %34 {strides = array<i32>} : memref<32x256xbf16, #tpu.memory_space<vmem>>, vector<32x256xbf16>,
    return
  }
  func.func @transform_0(%arg0: i32) -> (i32, i32) {
    %c0_i32 = arith.constant 0 : i32
    %c0_i32_0 = arith.constant 0 : i32
    return %arg0, %c0_i32 : i32, i32
  }
  func.func @transform_1(%arg0: i32) -> (i32, i32) {
    %c0_i32 = arith.constant 0 : i32
    %c0_i32_0 = arith.constant 0 : i32
    %c0_i32_1 = arith.constant 0 : i32
    return %c0_i32, %c0_i32_0 : i32, i32
  }
  func.func @transform_2(%arg0: i32) -> (i32, i32) {
    %c0_i32 = arith.constant 0 : i32
    %c0_i32_0 = arith.constant 0 : i32
    %c0_i32_1 = arith.constant 0 : i32
    return %c0_i32, %c0_i32_0 : i32, i32
  }
  func.func @transform_3(%arg0: i32) -> (i32, i32) {
    %c0_i32 = arith.constant 0 : i32
    %c0_i32_0 = arith.constant 0 : i32
    %c0_i32_1 = arith.constant 0 : i32
    return %c0_i32, %c0_i32_0 : i32, i32
  }
  func.func @transform_4(%arg0: i32) -> (i32, i32) {
    %c0_i32 = arith.constant 0 : i32
    %c0_i32_0 = arith.constant 0 : i32
    %c0_i32_1 = arith.constant 0 : i32
    return %c0_i32, %c0_i32_0 : i32, i32
  }
  func.func @transform_5(%arg0: i32) -> (i32, i32) {
    %c0_i32 = arith.constant 0 : i32
    %c0_i32_0 = arith.constant 0 : i32
    %c0_i32_1 = arith.constant 0 : i32
    return %c0_i32, %c0_i32_0 : i32, i32
  }
  func.func @transform_6(%arg0: i32) -> (i32, i32) {
    %c0_i32 = arith.constant 0 : i32
    %c0_i32_0 = arith.constant 0 : i32
    %c0_i32_1 = arith.constant 0 : i32
    return %c0_i32, %c0_i32_0 : i32, i32
  }
  func.func @transform_7(%arg0: i32) -> (i32, i32) {
    %c0_i32 = arith.constant 0 : i32
    %c0_i32_0 = arith.constant 0 : i32
    %c0_i32_1 = arith.constant 0 : i32
    return %c0_i32, %c0_i32_0 : i32, i32
  }
  func.func @transform_8(%arg0: i32) -> (i32, i32) {
    %c0_i32 = arith.constant 0 : i32
    %c0_i32_0 = arith.constant 0 : i32
    %c0_i32_1 = arith.constant 0 : i32
    return %c0_i32, %c0_i32_0 : i32, i32
  }
  func.func @transform_9(%arg0: i32) -> (i32, i32) {
    %c0_i32 = arith.constant 0 : i32
    %c0_i32_0 = arith.constant 0 : i32
    return %arg0, %c0_i32 : i32, i32
  }
  func.func @transform_10(%arg0: i32) -> (i32, i32) {
    %c0_i32 = arith.constant 0 : i32
    %c0_i32_0 = arith.constant 0 : i32
    return %arg0, %c0_i32 : i32, i32
  }
}

</mosaic_0001>

<bundles_post_ra>
// kernel: _forward_impl.1
= control target key start
LH: loop header
LB: loop body
LE: loop exit
PB: predicated region body
PF: predicated region fallthrough
CT: control target
= control target key end

     0   :  { %16 = vsyncpa [#allocation3], 0  ;;  %s1827_s0 = inlined_call_operand.vmem [shape: bf16[64,256], index: 0, kind: input, shape index: {}]   ;;  %s1828_s1 = inlined_call_operand.hbm [shape: bf16[256,128], index: 1, kind: input, shape index: {}]   ;;  %s1829_s2 = inlined_call_operand.vmem [shape: f32[1,128], index: 2, kind: input, shape index: {}]   ;;  %s1830_s3 = inlined_call_operand.vmem [shape: bf16[128,128], index: 3, kind: input, shape index: {}]   ;;  %s1831_s4 = inlined_call_operand.vmem [shape: f32[1,128], index: 4, kind: input, shape index: {}]   ;;  %s1832_s5 = inlined_call_operand.hbm [shape: bf16[128,128], index: 5, kind: input, shape index: {}]   ;;  %s1833_s6 = inlined_call_operand.vmem [shape: f32[1,128], index: 6, kind: input, shape index: {}]   ;;  %s1834_s7 = inlined_call_operand.hbm [shape: bf16[128,256], index: 7, kind: input, shape index: {}]   ;;  %s1835_s8 = inlined_call_operand.vmem [shape: f32[1,256], index: 8, kind: input, shape index: {}]   ;;  %s1836_s9 = inlined_call_operand.vmem [shape: bf16[64,256], index: 9, kind: output, shape index: {0}]   ;;  %s1837_s10 = inlined_call_operand.vmem [shape: bf16[64,128], index: 10, kind: output, shape index: {1}]  }
   0x1   :  { %17 = vsyncpa [#allocation5], 0  ;;  %s1687_s13 = smov 0  }
   0x2 LB: > { %s1231_s14 = sadd.s32 4294967295, %s1622_s13   ;;  %p1233_p0 = scmp.ge.s32.totalorder %s1622_s13, 1  ;;  %s1622_s13 = sphi %s1687_s13, %s23_s13  }
   0x3   : > { %p274_p1 = scmp.lt.s32.totalorder %s1622_s13, 3  ;;  %p1697_p2 = scmp.eq.s32.totalorder %s1231_s14, 0 }
   0x4   : > { %s1624_s17 = smov [#allocation4]   ;;  %s1625_s19 = smov [#allocation2]  }
   0x5   : > { %p1701_p3 = pnand %p1233_p0, %p274_p1  ;;  %s308_s18 = sshll.u32 %s1624_s17, 4  ;;  %s309_s18 = int_to_ptr.vmem [resolvable:$true] %s308_s18 }
   0x6   : > { %s286_s20 = sshll.u32 %s1625_s19, 4  ;;  %s1626_s22 = smov [#allocation6]   ;;  %s1707_s20 = int_to_ptr.vmem [resolvable:$true] %s286_s20 }
   0x7   : > { %p1436_p4 = pneg %p1701_p3  ;;  %s324_s23 = sshll.u32 %s1626_s22, 4  ;;  %s1715_s23 = int_to_ptr.vmem [resolvable:$true] %s324_s23 }
   0x8   : > { %s1541_s24 = scalar_lea.vmem %s309_s18, 1024  ;;  %p1549_p10 = scmp.lt.s32.totalorder %s309_s18, %s309_s18 }
   0x9   : > { %p1711_p5 = pnand %p1697_p2, %p1436_p4  ;;  %p1542_p7 = scmp.ne.s32.totalorder %s309_s18, %s1541_s24 }
   0xa   : > { %p1550_p11 = scmp.lt.s32.totalorder %s1541_s24, %s1541_s24 }
   0xb   : > { %p1532_p6 = pneg %p1711_p5 }
   0xc   : > { %p1551_p12 = por %p1550_p11, %p1549_p10 }
   0xd   : > { %p1544_p8 = pnand %p1542_p7, %p1532_p6 }
   0xf   : > { %p1545_p9 = pneg %p1544_p8 }
  0x11   : > { %p1552_p13 = pnand %p1551_p12, %p1545_p9 }
  0x13   : > { %1555 = shalt.err (!%p1552_p13)
}
  0x14   : > { %s1627_s25 = smov 64   ;;  %s1628_s26 = smov 4  }
  0x15   : > { %1442 = dma.hbm_to_vmem [thread:$0]  (!%p1711_p5), %s1832_s5, 1024, %s309_s18, [#allocation5], %s1627_s25, %s1627_s25, %s1628_s26  }
  0x16   : > { %s1567_s29 = scalar_lea.vmem %s1707_s20, 2048  ;;  %p1575_p7 = scmp.lt.s32.totalorder %s1707_s20, %s1707_s20 }
  0x17   : > { %p1568_p0 = scmp.ne.s32.totalorder %s1707_s20, %s1567_s29  ;;  %p1576_p8 = scmp.lt.s32.totalorder %s1567_s29, %s1567_s29 }
  0x19   : > { %p1570_p1 = pnand %p1568_p0, %p1532_p6  ;;  %p1577_p9 = por %p1576_p8, %p1575_p7 }
  0x1b   : > { %p1571_p4 = pneg %p1570_p1 }
  0x1d   : > { %p1578_p10 = pnand %p1577_p9, %p1571_p4 }
  0x1f   : > { %1581 = shalt.err (!%p1578_p10)
}
  0x20   : > { %1439 = dma.hbm_to_vmem [thread:$0]  (!%p1711_p5), %s1828_s1, 2048, %s1707_s20, [#allocation3], %s1627_s25, %s1627_s25, %s1628_s26  }
  0x21   : > { %s1593_s12 = scalar_lea.vmem %s1715_s23, 2048  ;;  %p1601_p0 = scmp.lt.s32.totalorder %s1715_s23, %s1715_s23 }
  0x22   : > { %p1594_p11 = scmp.ne.s32.totalorder %s1715_s23, %s1593_s12  ;;  %p1602_p1 = scmp.lt.s32.totalorder %s1593_s12, %s1593_s12 }
  0x24   : > { %p1596_p12 = pnand %p1594_p11, %p1532_p6  ;;  %p1603_p4 = por %p1602_p1, %p1601_p0 }
  0x26   : > { %p1597_p13 = pneg %p1596_p12 }
  0x28   : > { %p1604_p7 = pnand %p1603_p4, %p1597_p13 }
  0x2a   : > { %1607 = shalt.err (!%p1604_p7)
}
  0x2b   : > { %s1629_s17 = smov 128   ;;  %s1630_s18 = smov 8  }
  0x2c   : > { %1445 = dma.hbm_to_vmem [thread:$0]  (!%p1711_p5), %s1834_s7, 2048, %s1715_s23, [#allocation5], %s1629_s17, %s1629_s17, %s1630_s18  }
  0x2d   : > { %353 = sbr.rel (%p1701_p3) target bundleno = 926 (0x39e), region = 56 }
  0x32   : > { %1613 = dma.done.wait (%p1697_p2), [#allocation3], 2048  }
  0x33   : > { %1615 = vsyncadd (%p1697_p2), [#allocation3], 4294965248 }
  0x34   : > { %1617 = dma.done.wait (%p1697_p2), [#allocation5], 3072  }
  0x35   : > { %1619 = vsyncadd (%p1697_p2), [#allocation5], 4294964224  ;;  %v1468_v0 = vld [vmem:[#allocation2 + $0x78] sm:$0xff]   ;;  %s1242_s20 = sshll.u32 %s1231_s14, 2  ;;  %v1470_v2 = vld [vmem:[#allocation2 + $0x70] sm:$0xff]  }
  0x36   : > { %v1469_v1 = vld [vmem:[#allocation2 + $0x38] sm:$0xff]   ;;  %1336 = vmatprep.subr.bf16.mxu0 %v1468_v0  ;;  %v1471_v3 = vld [vmem:[#allocation2 + $0x30] sm:$0xff]   ;;  %p407_p3 = scmp.lt.s32.totalorder %s1242_s20, 7  ;;  %v1472_v4 = vld [vmem:[#allocation2 + $0x68] sm:$0xff]  }
  0x37   : > { %1337 = vmatpush3.bf16.msra.mxu0 %v1469_v1  ;;  %v1473_v5 = vld [vmem:[#allocation2 + $0x28] sm:$0xff]   ;;  %v1474_v6 = vld [vmem:[#allocation2 + $0x60] sm:$0xff]   ;;  %v1476_v8 = vld [vmem:[#allocation2 + $0x58] sm:$0xff]  }
  0x38   : > { %1338 = vmatprep.subr.bf16.mxu0 %v1470_v2  ;;  %s1842_s20 = smov (!%p407_p3, %s1242_s20), 7  ;;  %v1475_v7 = vld [vmem:[#allocation2 + $0x20] sm:$0xff]   ;;  %v1477_v9 = vld [vmem:[#allocation2 + $0x18] sm:$0xff]   ;;  %v1478_v10 = vld [vmem:[#allocation2 + $0x50] sm:$0xff]  }
  0x39   : > { %s1315_s15 = sshll.u32 %s1842_s20, 3  ;;  %v1479_v12 = vld [vmem:[#allocation2 + $0x10] sm:$0xff]   ;;  %v1480_v13 = vld [vmem:[#allocation2 + $0x48] sm:$0xff]   ;;  %v1490_v14 = vld [vmem:[%s1830_s3 + $0x38] sm:$0xff]   ;;  %s1249_s26 = sshll.u32 %s1842_s20, 2 }
  0x3a   : > { %s1773_s21 = scalar_lea.vmem %s1827_s0, %s1315_s15  ;;  %v1491_v15 = vld [vmem:[%s1830_s3 + $0x30] sm:$0xff]   ;;  %v1481_v16 = vld [vmem:[#allocation2 + $0x8] sm:$0xff]   ;;  %1384 = vmatprep.subr.bf16.mxu1 %v1490_v14  ;;  %v1482_v18 = vld [vmem:[#allocation2 + $0x40] sm:$0xff]   ;;  %s424_s29 = scalar_lea.vmem %s1837_s10, %s1249_s26 }
  0x3b   : > { %1339 = vmatpush3.bf16.msra.mxu0 %v1471_v3  ;;  %v1486_v11 = vld [vmem:[%s1773_s21 + $0x4] ss:$8 sps:$4 sm:$0xff]   ;;  %1385 = vmatpush3.bf16.msra.mxu1 %v1490_v14  ;;  %v1484_v20 = vld [vmem:[%s1773_s21] ss:$8 sps:$4 sm:$0xff]   ;;  %v1487_v21 = vld [vmem:[%s1773_s21 + $0x14] ss:$8 sps:$4 sm:$0xff]   ;;  %s418_s22 = scalar_lea.vmem %s1836_s9, %s1315_s15 }
  0x3c   : > { %1340 = vmatprep.subr.bf16.mxu0 %v1472_v4  ;;  %618 = vmatprep.mubr.bf16.mxu0 %v1486_v11  ;;  %v1492_v17 = vld [vmem:[%s1830_s3 + $0x28] sm:$0xff]   ;;  %v1483_v19 = vld [vmem:[#allocation2] sm:$0xff]   ;;  %v1489_v22 = vld [vmem:[%s1773_s21 + $0x10] ss:$8 sps:$4 sm:$0xff]  }
  0x3d   : > { %1386 = vmatprep.subr.bf16.mxu1 %v1491_v15  ;;  %v1493_v23 = vld [vmem:[%s1830_s3 + $0x20] sm:$0xff]   ;;  %v1494_v24 = vld [vmem:[%s1830_s3 + $0x18] sm:$0xff]   ;;  %v1495_v25 = vld [vmem:[%s1830_s3 + $0x10] sm:$0xff]  }
  0x3e   : > { %v1496_v26 = vld [vmem:[%s1830_s3 + $0x8] sm:$0xff]   ;;  %v1497_v27 = vld [vmem:[%s1830_s3] sm:$0xff]   ;;  %v1498_v28 = vld [vmem:[#allocation4 + $0x38] sm:$0xff]  }
  0x3f   : > { %1341 = vmatpush3.bf16.msra.mxu0 %v1473_v5  ;;  %1387 = vmatpush3.bf16.msra.mxu1 %v1491_v15  ;;  %v1499_v29 = vld [vmem:[#allocation4 + $0x30] sm:$0xff]   ;;  %v1500_v30 = vld [vmem:[#allocation4 + $0x28] sm:$0xff]   ;;  %v1501_v31 = vld [vmem:[#allocation4 + $0x20] sm:$0xff]  }
  0x40   : > { %1342 = vmatprep.subr.bf16.mxu0 %v1474_v6  ;;  %1388 = vmatprep.subr.bf16.mxu1 %v1492_v17  ;;  %v1502_v32 = vld [vmem:[#allocation4 + $0x18] sm:$0xff]   ;;  %v1250_v37 = vld [vmem:[%s1829_s2] ss:$0 sm:$0xff]  ;;  %v1503_v56 = vld [vmem:[#allocation4 + $0x10] sm:$0xff]  }
  0x41   : > { %v1504_v57 = vld [vmem:[#allocation4 + $0x8] sm:$0xff]   ;;  %v1505_v58 = vld [vmem:[#allocation4] sm:$0xff]   ;;  %v1506_v59 = vld [vmem:[#allocation6 + $0x70] ss:$8 sps:$4 sm:$0xff]  }
  0x42   : > { %v1508_v60 = vld [vmem:[#allocation6 + $0x74] ss:$8 sps:$4 sm:$0xff]   ;;  %v1511_v61 = vld [vmem:[#allocation6 + $0x64] ss:$8 sps:$4 sm:$0xff]   ;;  %v1509_v62 = vld [vmem:[#allocation6 + $0x60] ss:$8 sps:$4 sm:$0xff]  }
  0x43   : > { %1343 = vmatpush3.bf16.msra.mxu0 %v1475_v7  ;;  %1389 = vmatpush3.bf16.msra.mxu1 %v1492_v17  ;;  %v1514_v63 = vld [vmem:[#allocation6 + $0x54] ss:$8 sps:$4 sm:$0xff]   ;;  %v1512_v0 = vld [vmem:[#allocation6 + $0x50] ss:$8 sps:$4 sm:$0xff]   ;;  %v1517_v1 = vld [vmem:[#allocation6 + $0x44] ss:$8 sps:$4 sm:$0xff]  }
  0x44   : > { %1344 = vmatprep.subr.bf16.mxu0 %v1476_v8  ;;  %1390 = vmatprep.subr.bf16.mxu1 %v1493_v23  ;;  %v1515_v2 = vld [vmem:[#allocation6 + $0x40] ss:$8 sps:$4 sm:$0xff]   ;;  %v1520_v3 = vld [vmem:[#allocation6 + $0x34] ss:$8 sps:$4 sm:$0xff]   ;;  %v1518_v4 = vld [vmem:[#allocation6 + $0x30] ss:$8 sps:$4 sm:$0xff]  }
  0x45   : > { %v1271_v7 = vld [vmem:[%s1831_s4] ss:$0 sm:$0xff] }
  0x47   : > { %1345 = vmatpush3.bf16.msra.mxu0 %v1477_v9  ;;  %1391 = vmatpush3.bf16.msra.mxu1 %v1493_v23  ;;  %v1524_v23 = vld [vmem:[#allocation6 + $0x10] ss:$8 sps:$4 sm:$0xff]  }
  0x48   : > { %1346 = vmatprep.subr.bf16.mxu0 %v1478_v10  ;;  %1392 = vmatprep.subr.bf16.mxu1 %v1494_v24 }
  0x4b   : > { %1347 = vmatpush3.bf16.msra.mxu0 %v1479_v12  ;;  %1393 = vmatpush3.bf16.msra.mxu1 %v1494_v24  ;;  %v1529_v24 = vld [vmem:[#allocation6 + $0x4] ss:$8 sps:$4 sm:$0xff]  }
  0x4c   : > { %1348 = vmatprep.subr.bf16.mxu0 %v1480_v13  ;;  %1394 = vmatprep.subr.bf16.mxu1 %v1495_v25 }
  0x4f   : > { %1349 = vmatpush3.bf16.msra.mxu0 %v1481_v16  ;;  %1395 = vmatpush3.bf16.msra.mxu1 %v1495_v25  ;;  %v1527_v25 = vld [vmem:[#allocation6] ss:$8 sps:$4 sm:$0xff]  }
  0x50   : > { %1350 = vmatprep.subr.bf16.mxu0 %v1482_v18  ;;  %1396 = vmatprep.subr.bf16.mxu1 %v1496_v26 }
  0x53   : > { %1351 = vmatpush3.bf16.msra.mxu0 %v1483_v19  ;;  %1397 = vmatpush3.bf16.msra.mxu1 %v1496_v26  ;;  %v1631_v26 = vmov 0  }
  0x54   : > { %1398 = vmatprep.subr.bf16.mxu1 %v1497_v27  ;;  %1404 = vmatprep.subr.bf16.mxu0 %v1498_v28 }
  0x56   : > { %619 = vmatmul.mubr.bf16.vlgmr.msra.gmra.mxu0 %v1484_v20  ;;  %v1523_v20 = vld [vmem:[#allocation6 + $0x24] ss:$8 sps:$4 sm:$0xff]  }
  0x57   : > { %626 = vmatprep.mubr.bf16.mxu0 %v1487_v21  ;;  %1399 = vmatpush3.bf16.msra.mxu1 %v1497_v27  ;;  %v1521_v21 = vld [vmem:[#allocation6 + $0x20] ss:$8 sps:$4 sm:$0xff]  }
  0x58   : > { %1405 = vmatpush3.bf16.msra.mxu0 %v1498_v28  ;;  %1001 = vmatprep.subr.bf16.mxu1 %v1508_v60 }
  0x59   : > { %1406 = vmatprep.subr.bf16.mxu0 %v1499_v29 }
  0x5c   : > { %1407 = vmatpush3.bf16.msra.mxu0 %v1499_v29  ;;  %v1280_v29 = vld [vmem:[%s1833_s6] ss:$0 sm:$0xff] }
  0x5d   : > { %1408 = vmatprep.subr.bf16.mxu0 %v1500_v30 }
  0x5e   : > { %627 = vmatmul.mubr.bf16.gmra.mxu0 %v1489_v22  ;;  %v1526_v22 = vld [vmem:[#allocation6 + $0x14] ss:$8 sps:$4 sm:$0xff]  }
  0x60   : > { %1409 = vmatpush3.bf16.msra.mxu0 %v1500_v30 }
  0x61   : > { %1410 = vmatprep.subr.bf16.mxu0 %v1501_v31 }
  0x64   : > { %1411 = vmatpush3.bf16.msra.mxu0 %v1501_v31 }
  0x65   : > { %1412 = vmatprep.subr.bf16.mxu0 %v1502_v32 }
  0x68   : > { %1413 = vmatpush3.bf16.msra.mxu0 %v1502_v32 }
  0x69   : > { %1414 = vmatprep.subr.bf16.mxu0 %v1503_v56 }
  0x6c   : > { %1415 = vmatpush3.bf16.msra.mxu0 %v1503_v56 }
  0x6d   : > { %1416 = vmatprep.subr.bf16.mxu0 %v1504_v57 }
  0x70   : > { %1417 = vmatpush3.bf16.msra.mxu0 %v1504_v57 }
  0x71   : > { %1418 = vmatprep.subr.bf16.mxu0 %v1505_v58 }
  0x74   : > { %1419 = vmatpush3.bf16.msra.mxu0 %v1505_v58 }
 0x116   : > { %v1352_v33 = vpop.f32.mrf.mxu0 }
 0x118   : > { %v1353_v34 = vpop.f32.mrf.mxu0 }
 0x119   : > { %v1354_v35 = vadd.f32 %v1353_v34, %v1352_v33 }
 0x11a   : > { %v1355_v36 = vpop.f32.mrf.mxu0 }
 0x11b   : > { %v621_v40 = vadd.f32 %v1354_v35, %v1250_v37 }
 0x11c   : > { %v1356_v38 = vpop.f32.mrf.mxu0 }
 0x11d   : > { %v1357_v39 = vadd.f32 %v1356_v38, %v1355_v36  ;;  %v635_v45 = vmax.f32 %v621_v40, 0.0 }
 0x11e   : > { %v1358_v41 = vpop.f32.mrf.mxu0 }
 0x11f   : > { %v624_v42 = vadd.f32 %v1357_v39, %v1250_v37 }
 0x120   : > { %v1359_v43 = vpop.f32.mrf.mxu0 }
 0x121   : > { %v1360_v44 = vadd.f32 %v1359_v43, %v1358_v41  ;;  %v636_v46 = vmax.f32 %v624_v42, 0.0  ;;  %v911_v42 = vlaneseq }
 0x122   : > { %v1361_v47 = vpop.f32.mrf.mxu0 }
 0x123   : > { %v639_v48 = vpack.c.bf16 %v636_v46, %v635_v45  ;;  %v629_v50 = vadd.f32 %v1360_v44, %v1250_v37  ;;  %v912_v43 = vshrl.u32 %v911_v42, 7  ;;  %v909_v45 = vld [vmem:[%s1835_s8] sm:$0x3] }
 0x124   : > { %v1362_v49 = vpop.f32.mrf.mxu0 }
 0x125   : > { %v1363_v51 = vadd.f32 %v1362_v49, %v1361_v47  ;;  %1400 = vmatprep.mubr.bf16.mxu1 %v639_v48  ;;  %v637_v53 = vmax.f32 %v629_v50, 0.0  ;;  %v913_v44 = vsub.s32 0, %v912_v43  ;;  %v917_v46 = vsub.s32 1, %v912_v43 }
 0x127   : > { %v632_v52 = vadd.f32 %v1363_v51, %v1250_v37  ;;  %v914_v47 = vrot.slane %v909_v45, %v913_v44  ;;  %v918_v48 = vrot.slane %v909_v45, %v917_v46 }
 0x129   : > { %v638_v54 = vmax.f32 %v632_v52, 0.0 }
 0x12b   : > { %v640_v55 = vpack.c.bf16 %v638_v54, %v637_v53 }
 0x12d   : > { %1401 = vmatmul.mubr.bf16.vlgmr.msra.gmra.mxu1 %v640_v55 }
 0x12e   : > { %1002 = vmatpush1.bf16.msra.mxu1 %v1506_v59  ;;  %1033 = vmatprep.mubr.bf16.mxu1 %v1631_v26 }
 0x12f   : > { %1003 = vmatprep.subr.bf16.mxu1 %v1511_v61 }
 0x132   : > { %1004 = vmatpush1.bf16.msra.mxu1 %v1509_v62 }
 0x133   : > { %1005 = vmatprep.subr.bf16.mxu1 %v1514_v63 }
 0x136   : > { %1006 = vmatpush1.bf16.msra.mxu1 %v1512_v0 }
 0x137   : > { %1007 = vmatprep.subr.bf16.mxu1 %v1517_v1 }
 0x13a   : > { %1008 = vmatpush1.bf16.msra.mxu1 %v1515_v2 }
 0x13b   : > { %1009 = vmatprep.subr.bf16.mxu1 %v1520_v3 }
 0x13e   : > { %1010 = vmatpush1.bf16.msra.mxu1 %v1518_v4 }
 0x13f   : > { %1011 = vmatprep.subr.bf16.mxu1 %v1523_v20 }
 0x142   : > { %1012 = vmatpush1.bf16.msra.mxu1 %v1521_v21 }
 0x143   : > { %1013 = vmatprep.subr.bf16.mxu1 %v1526_v22 }
 0x146   : > { %1014 = vmatpush1.bf16.msra.mxu1 %v1524_v23 }
 0x147   : > { %1015 = vmatprep.subr.bf16.mxu1 %v1529_v24 }
 0x14a   : > { %1016 = vmatpush1.bf16.msra.mxu1 %v1527_v25 }
 0x1ed   : > { %v1402_v5 = vpop.f32.mrf.mxu1 }
 0x1ee   : > { %v755_v11 = vadd.f32 %v1402_v5, %v1271_v7 }
 0x1ef   : > { %v746_v6 = vpop.f32.mrf.mxu1 }
 0x1f0   : > { %v747_v9 = vadd.f32 %v1271_v7, %v746_v6  ;;  %v763_v17 = vmax.f32 %v755_v11, 0.0 }
 0x1f1   : > { %v1403_v8 = vpop.f32.mrf.mxu1 }
 0x1f2   : > { %v758_v10 = vadd.f32 %v1403_v8, %v1271_v7  ;;  %v761_v15 = vmax.f32 %v747_v9, 0.0 }
 0x1f3   : > { %v749_v12 = vpop.f32.mrf.mxu1 }
 0x1f4   : > { %v750_v13 = vadd.f32 %v1271_v7, %v749_v12  ;;  %v764_v14 = vmax.f32 %v758_v10, 0.0 }
 0x1f6   : > { %v762_v16 = vmax.f32 %v750_v13, 0.0  ;;  %v766_v19 = vpack.c.bf16 %v764_v14, %v763_v17 }
 0x1f8   : > { %v765_v18 = vpack.c.bf16 %v762_v16, %v761_v15  ;;  %1335 = vst [vmem:[%s424_s29 + $0x8] sm:$0xff] %v766_v19  }
 0x1fa   : > { %1329 = vst [vmem:[%s424_s29] sm:$0xff] %v765_v18   ;;  %1420 = vmatprep.mubr.bf16.mxu0 %v765_v18 }
 0x1fb   : > { %1421 = vmatmul.mubr.bf16.vlgmr.msra.gmra.mxu0 %v766_v19 }
 0x2bb   : > { %v1422_v27 = vpop.f32.mrf.mxu0 }
 0x2bc   : > { %v881_v38 = vadd.f32 %v1422_v27, %v1280_v29 }
 0x2bd   : > { %v872_v28 = vpop.f32.mrf.mxu0 }
 0x2be   : > { %v873_v31 = vadd.f32 %v1280_v29, %v872_v28  ;;  %v889_v40 = vmax.f32 %v881_v38, 0.0 }
 0x2bf   : > { %v1423_v30 = vpop.f32.mrf.mxu0 }
 0x2c0   : > { %v887_v34 = vmax.f32 %v873_v31, 0.0  ;;  %v884_v36 = vadd.f32 %v1423_v30, %v1280_v29 }
 0x2c1   : > { %v875_v32 = vpop.f32.mrf.mxu0 }
 0x2c2   : > { %v876_v33 = vadd.f32 %v1280_v29, %v875_v32  ;;  %v890_v39 = vmax.f32 %v884_v36, 0.0 }
 0x2c4   : > { %v888_v35 = vmax.f32 %v876_v33, 0.0  ;;  %v892_v41 = vpack.c.bf16 %v890_v39, %v889_v40 }
 0x2c6   : > { %v891_v37 = vpack.c.bf16 %v888_v35, %v887_v34 }
 0x2c8   : > { %1034 = vmatmul.mubr.bf16.vlgmr.msra.gmra.mxu1 %v891_v37 }
 0x2c9   : > { %1043 = vmatprep.mubr.bf16.mxu1 %v1631_v26 }
 0x2d0   : > { %1044 = vmatmul.mubr.bf16.gmra.mxu1 %v892_v41 }
 0x388   : > { %v1035_v49 = vpop.f32.mrf.mxu1 }
 0x389   : > { %v1036_v50 = vadd.f32 %v1035_v49, %v914_v47 }
 0x38a   : > { %v1037_v51 = vpop.f32.mrf.mxu1 }
 0x38b   : > { %v1038_v52 = vadd.f32 %v1037_v51, %v918_v48  ;;  %v1054_v54 = vmax.f32 %v1036_v50, 0.0 }
 0x38c   : > { %v1039_v53 = vpop.f32.mrf.mxu1 }
 0x38d   : > { %v1055_v55 = vmax.f32 %v1038_v52, 0.0  ;;  %v1040_v56 = vadd.f32 %v1039_v53, %v914_v47 }
 0x38e   : > { %v1041_v57 = vpop.f32.mrf.mxu1 }
 0x38f   : > { %v1321_v58 = vpack.c.bf16 %v1055_v55, %v1054_v54  ;;  %v1042_v59 = vadd.f32 %v1041_v57, %v918_v48  ;;  %v1056_v61 = vmax.f32 %v1040_v56, 0.0 }
 0x390   : > { %v1045_v60 = vpop.f32.mrf.mxu1 }
 0x391   : > { %1104 = vst [vmem:[%s418_s22] sm:$0xff] %v1321_v58  ;;  %v1057_v62 = vmax.f32 %v1042_v59, 0.0  ;;  %v1046_v63 = vadd.f32 %v1045_v60, %v914_v47 }
 0x392   : > { %v1047_v0 = vpop.f32.mrf.mxu1 }
 0x393   : > { %v1322_v1 = vpack.c.bf16 %v1057_v62, %v1056_v61  ;;  %v1048_v2 = vadd.f32 %v1047_v0, %v918_v48  ;;  %v1058_v4 = vmax.f32 %v1046_v63, 0.0 }
 0x394   : > { %v1049_v3 = vpop.f32.mrf.mxu1 }
 0x395   : > { %1105 = vst [vmem:[%s418_s22 + $0x8] sm:$0xff] %v1322_v1  ;;  %v1059_v5 = vmax.f32 %v1048_v2, 0.0  ;;  %v1050_v6 = vadd.f32 %v1049_v3, %v914_v47 }
 0x396   : > { %v1051_v7 = vpop.f32.mrf.mxu1 }
 0x397   : > { %v1323_v8 = vpack.c.bf16 %v1059_v5, %v1058_v4  ;;  %v1052_v9 = vadd.f32 %v1051_v7, %v918_v48  ;;  %v1060_v10 = vmax.f32 %v1050_v6, 0.0 }
 0x399   : > { %1106 = vst [vmem:[%s418_s22 + $0x10] sm:$0xff] %v1323_v8  ;;  %v1061_v11 = vmax.f32 %v1052_v9, 0.0 }
 0x39b   : > { %v1324_v12 = vpack.c.bf16 %v1061_v11, %v1060_v10 }
 0x39d   : > { %1107 = vst [vmem:[%s418_s22 + $0x18] sm:$0xff] %v1324_v12 }
 0x39e PF: > { %s23_s13 = sadd.s32 1, %s1622_s13  }
 0x39f   : > { %p20_p2 = scmp.ge.s32.totalorder %s23_s13, 4  }
 0x3a1   :  { %22 = sbr.rel (!%p20_p2) target bundleno = 2 (0x2), region = 111 }
 0x3a6   :  { %1149 = vsyncpa [#allocation3], 1 }
 0x3a7   :  { %1151 = vsyncpa [#allocation3 + $0x1], 1 }
 0x3a8   :  { %1152 = vsyncpa [#allocation5], 1 }

// kernel: _forward_impl.1
= control target key start
LH: loop header
LB: loop body
LE: loop exit
PB: predicated region body
PF: predicated region fallthrough
CT: control target
= control target key end

     0   :  { %16 = vsyncpa [#allocation3], 0  ;;  %s1827_s0 = inlined_call_operand.vmem [shape: bf16[64,256], index: 0, kind: input, shape index: {}]   ;;  %s1828_s1 = inlined_call_operand.hbm [shape: bf16[256,128], index: 1, kind: input, shape index: {}]   ;;  %s1829_s2 = inlined_call_operand.vmem [shape: f32[1,128], index: 2, kind: input, shape index: {}]   ;;  %s1830_s3 = inlined_call_operand.vmem [shape: bf16[128,128], index: 3, kind: input, shape index: {}]   ;;  %s1831_s4 = inlined_call_operand.vmem [shape: f32[1,128], index: 4, kind: input, shape index: {}]   ;;  %s1832_s5 = inlined_call_operand.hbm [shape: bf16[128,128], index: 5, kind: input, shape index: {}]   ;;  %s1833_s6 = inlined_call_operand.vmem [shape: f32[1,128], index: 6, kind: input, shape index: {}]   ;;  %s1834_s7 = inlined_call_operand.hbm [shape: bf16[128,256], index: 7, kind: input, shape index: {}]   ;;  %s1835_s8 = inlined_call_operand.vmem [shape: f32[1,256], index: 8, kind: input, shape index: {}]   ;;  %s1836_s9 = inlined_call_operand.vmem [shape: bf16[64,256], index: 9, kind: output, shape index: {0}]   ;;  %s1837_s10 = inlined_call_operand.vmem [shape: bf16[64,128], index: 10, kind: output, shape index: {1}]  }
   0x1   :  { %17 = vsyncpa [#allocation5], 0  ;;  %s1687_s13 = smov 0  }
   0x2 LB: > { %s1231_s14 = sadd.s32 4294967295, %s1622_s13   ;;  %p1233_p0 = scmp.ge.s32.totalorder %s1622_s13, 1  ;;  %s1622_s13 = sphi %s1687_s13, %s23_s13  }
   0x3   : > { %p274_p1 = scmp.lt.s32.totalorder %s1622_s13, 3  ;;  %p1697_p2 = scmp.eq.s32.totalorder %s1231_s14, 0 }
   0x4   : > { %s1624_s17 = smov [#allocation4]   ;;  %s1625_s19 = smov [#allocation2]  }
   0x5   : > { %p1701_p3 = pnand %p1233_p0, %p274_p1  ;;  %s308_s18 = sshll.u32 %s1624_s17, 4  ;;  %s309_s18 = int_to_ptr.vmem [resolvable:$true] %s308_s18 }
   0x6   : > { %s286_s20 = sshll.u32 %s1625_s19, 4  ;;  %s1626_s22 = smov [#allocation6]   ;;  %s1707_s20 = int_to_ptr.vmem [resolvable:$true] %s286_s20 }
   0x7   : > { %p1436_p4 = pneg %p1701_p3  ;;  %s324_s23 = sshll.u32 %s1626_s22, 4  ;;  %s1715_s23 = int_to_ptr.vmem [resolvable:$true] %s324_s23 }
   0x8   : > { %s1541_s24 = scalar_lea.vmem %s309_s18, 1024  ;;  %p1549_p10 = scmp.lt.s32.totalorder %s309_s18, %s309_s18 }
   0x9   : > { %p1711_p5 = pnand %p1697_p2, %p1436_p4  ;;  %p1542_p7 = scmp.ne.s32.totalorder %s309_s18, %s1541_s24 }
   0xa   : > { %p1550_p11 = scmp.lt.s32.totalorder %s1541_s24, %s1541_s24 }
   0xb   : > { %p1532_p6 = pneg %p1711_p5 }
   0xc   : > { %p1551_p12 = por %p1550_p11, %p1549_p10 }
   0xd   : > { %p1544_p8 = pnand %p1542_p7, %p1532_p6 }
   0xf   : > { %p1545_p9 = pneg %p1544_p8 }
  0x11   : > { %p1552_p13 = pnand %p1551_p12, %p1545_p9 }
  0x13   : > { %1555 = shalt.err (!%p1552_p13)
}
  0x14   : > { %s1627_s25 = smov 64   ;;  %s1628_s26 = smov 4  }
  0x15   : > { %1442 = dma.hbm_to_vmem [thread:$0]  (!%p1711_p5), %s1832_s5, 1024, %s309_s18, [#allocation5], %s1627_s25, %s1627_s25, %s1628_s26  }
  0x16   : > { %s1567_s29 = scalar_lea.vmem %s1707_s20, 2048  ;;  %p1575_p7 = scmp.lt.s32.totalorder %s1707_s20, %s1707_s20 }
  0x17   : > { %p1568_p0 = scmp.ne.s32.totalorder %s1707_s20, %s1567_s29  ;;  %p1576_p8 = scmp.lt.s32.totalorder %s1567_s29, %s1567_s29 }
  0x19   : > { %p1570_p1 = pnand %p1568_p0, %p1532_p6  ;;  %p1577_p9 = por %p1576_p8, %p1575_p7 }
  0x1b   : > { %p1571_p4 = pneg %p1570_p1 }
  0x1d   : > { %p1578_p10 = pnand %p1577_p9, %p1571_p4 }
  0x1f   : > { %1581 = shalt.err (!%p1578_p10)
}
  0x20   : > { %1439 = dma.hbm_to_vmem [thread:$0]  (!%p1711_p5), %s1828_s1, 2048, %s1707_s20, [#allocation3], %s1627_s25, %s1627_s25, %s1628_s26  }
  0x21   : > { %s1593_s12 = scalar_lea.vmem %s1715_s23, 2048  ;;  %p1601_p0 = scmp.lt.s32.totalorder %s1715_s23, %s1715_s23 }
  0x22   : > { %p1594_p11 = scmp.ne.s32.totalorder %s1715_s23, %s1593_s12  ;;  %p1602_p1 = scmp.lt.s32.totalorder %s1593_s12, %s1593_s12 }
  0x24   : > { %p1596_p12 = pnand %p1594_p11, %p1532_p6  ;;  %p1603_p4 = por %p1602_p1, %p1601_p0 }
  0x26   : > { %p1597_p13 = pneg %p1596_p12 }
  0x28   : > { %p1604_p7 = pnand %p1603_p4, %p1597_p13 }
  0x2a   : > { %1607 = shalt.err (!%p1604_p7)
}
  0x2b   : > { %s1629_s17 = smov 128   ;;  %s1630_s18 = smov 8  }
  0x2c   : > { %1445 = dma.hbm_to_vmem [thread:$0]  (!%p1711_p5), %s1834_s7, 2048, %s1715_s23, [#allocation5], %s1629_s17, %s1629_s17, %s1630_s18  }
  0x2d   : > { %353 = sbr.rel (%p1701_p3) target bundleno = 926 (0x39e), region = 56 }
  0x32   : > { %1613 = dma.done.wait (%p1697_p2), [#allocation3], 2048  }
  0x33   : > { %1615 = vsyncadd (%p1697_p2), [#allocation3], 4294965248 }
  0x34   : > { %1617 = dma.done.wait (%p1697_p2), [#allocation5], 3072  }
  0x35   : > { %1619 = vsyncadd (%p1697_p2), [#allocation5], 4294964224  ;;  %v1468_v0 = vld [vmem:[#allocation2 + $0x78] sm:$0xff]   ;;  %s1242_s20 = sshll.u32 %s1231_s14, 2  ;;  %v1470_v2 = vld [vmem:[#allocation2 + $0x70] sm:$0xff]  }
  0x36   : > { %v1469_v1 = vld [vmem:[#allocation2 + $0x38] sm:$0xff]   ;;  %1336 = vmatprep.subr.bf16.mxu0 %v1468_v0  ;;  %v1471_v3 = vld [vmem:[#allocation2 + $0x30] sm:$0xff]   ;;  %p407_p3 = scmp.lt.s32.totalorder %s1242_s20, 7  ;;  %v1472_v4 = vld [vmem:[#allocation2 + $0x68] sm:$0xff]  }
  0x37   : > { %1337 = vmatpush3.bf16.msra.mxu0 %v1469_v1  ;;  %v1473_v5 = vld [vmem:[#allocation2 + $0x28] sm:$0xff]   ;;  %v1474_v6 = vld [vmem:[#allocation2 + $0x60] sm:$0xff]   ;;  %v1476_v8 = vld [vmem:[#allocation2 + $0x58] sm:$0xff]  }
  0x38   : > { %1338 = vmatprep.subr.bf16.mxu0 %v1470_v2  ;;  %s1842_s20 = smov (!%p407_p3, %s1242_s20), 7  ;;  %v1475_v7 = vld [vmem:[#allocation2 + $0x20] sm:$0xff]   ;;  %v1477_v9 = vld [vmem:[#allocation2 + $0x18] sm:$0xff]   ;;  %v1478_v10 = vld [vmem:[#allocation2 + $0x50] sm:$0xff]  }
  0x39   : > { %s1315_s15 = sshll.u32 %s1842_s20, 3  ;;  %v1479_v12 = vld [vmem:[#allocation2 + $0x10] sm:$0xff]   ;;  %v1480_v13 = vld [vmem:[#allocation2 + $0x48] sm:$0xff]   ;;  %v1490_v14 = vld [vmem:[%s1830_s3 + $0x38] sm:$0xff]   ;;  %s1249_s26 = sshll.u32 %s1842_s20, 2 }
  0x3a   : > { %s1773_s21 = scalar_lea.vmem %s1827_s0, %s1315_s15  ;;  %v1491_v15 = vld [vmem:[%s1830_s3 + $0x30] sm:$0xff]   ;;  %v1481_v16 = vld [vmem:[#allocation2 + $0x8] sm:$0xff]   ;;  %1384 = vmatprep.subr.bf16.mxu1 %v1490_v14  ;;  %v1482_v18 = vld [vmem:[#allocation2 + $0x40] sm:$0xff]   ;;  %s424_s29 = scalar_lea.vmem %s1837_s10, %s1249_s26 }
  0x3b   : > { %1339 = vmatpush3.bf16.msra.mxu0 %v1471_v3  ;;  %v1486_v11 = vld [vmem:[%s1773_s21 + $0x4] ss:$8 sps:$4 sm:$0xff]   ;;  %1385 = vmatpush3.bf16.msra.mxu1 %v1490_v14  ;;  %v1484_v20 = vld [vmem:[%s1773_s21] ss:$8 sps:$4 sm:$0xff]   ;;  %v1487_v21 = vld [vmem:[%s1773_s21 + $0x14] ss:$8 sps:$4 sm:$0xff]   ;;  %s418_s22 = scalar_lea.vmem %s1836_s9, %s1315_s15 }
  0x3c   : > { %1340 = vmatprep.subr.bf16.mxu0 %v1472_v4  ;;  %618 = vmatprep.mubr.bf16.mxu0 %v1486_v11  ;;  %v1492_v17 = vld [vmem:[%s1830_s3 + $0x28] sm:$0xff]   ;;  %v1483_v19 = vld [vmem:[#allocation2] sm:$0xff]   ;;  %v1489_v22 = vld [vmem:[%s1773_s21 + $0x10] ss:$8 sps:$4 sm:$0xff]  }
  0x3d   : > { %1386 = vmatprep.subr.bf16.mxu1 %v1491_v15  ;;  %v1493_v23 = vld [vmem:[%s1830_s3 + $0x20] sm:$0xff]   ;;  %v1494_v24 = vld [vmem:[%s1830_s3 + $0x18] sm:$0xff]   ;;  %v1495_v25 = vld [vmem:[%s1830_s3 + $0x10] sm:$0xff]  }
  0x3e   : > { %v1496_v26 = vld [vmem:[%s1830_s3 + $0x8] sm:$0xff]   ;;  %v1497_v27 = vld [vmem:[%s1830_s3] sm:$0xff]   ;;  %v1498_v28 = vld [vmem:[#allocation4 + $0x38] sm:$0xff]  }
  0x3f   : > { %1341 = vmatpush3.bf16.msra.mxu0 %v1473_v5  ;;  %1387 = vmatpush3.bf16.msra.mxu1 %v1491_v15  ;;  %v1499_v29 = vld [vmem:[#allocation4 + $0x30] sm:$0xff]   ;;  %v1500_v30 = vld [vmem:[#allocation4 + $0x28] sm:$0xff]   ;;  %v1501_v31 = vld [vmem:[#allocation4 + $0x20] sm:$0xff]  }
  0x40   : > { %1342 = vmatprep.subr.bf16.mxu0 %v1474_v6  ;;  %1388 = vmatprep.subr.bf16.mxu1 %v1492_v17  ;;  %v1502_v32 = vld [vmem:[#allocation4 + $0x18] sm:$0xff]   ;;  %v1250_v37 = vld [vmem:[%s1829_s2] ss:$0 sm:$0xff]  ;;  %v1503_v56 = vld [vmem:[#allocation4 + $0x10] sm:$0xff]  }
  0x41   : > { %v1504_v57 = vld [vmem:[#allocation4 + $0x8] sm:$0xff]   ;;  %v1505_v58 = vld [vmem:[#allocation4] sm:$0xff]   ;;  %v1506_v59 = vld [vmem:[#allocation6 + $0x70] ss:$8 sps:$4 sm:$0xff]  }
  0x42   : > { %v1508_v60 = vld [vmem:[#allocation6 + $0x74] ss:$8 sps:$4 sm:$0xff]   ;;  %v1511_v61 = vld [vmem:[#allocation6 + $0x64] ss:$8 sps:$4 sm:$0xff]   ;;  %v1509_v62 = vld [vmem:[#allocation6 + $0x60] ss:$8 sps:$4 sm:$0xff]  }
  0x43   : > { %1343 = vmatpush3.bf16.msra.mxu0 %v1475_v7  ;;  %1389 = vmatpush3.bf16.msra.mxu1 %v1492_v17  ;;  %v1514_v63 = vld [vmem:[#allocation6 + $0x54] ss:$8 sps:$4 sm:$0xff]   ;;  %v1512_v0 = vld [vmem:[#allocation6 + $0x50] ss:$8 sps:$4 sm:$0xff]   ;;  %v1517_v1 = vld [vmem:[#allocation6 + $0x44] ss:$8 sps:$4 sm:$0xff]  }
  0x44   : > { %1344 = vmatprep.subr.bf16.mxu0 %v1476_v8  ;;  %1390 = vmatprep.subr.bf16.mxu1 %v1493_v23  ;;  %v1515_v2 = vld [vmem:[#allocation6 + $0x40] ss:$8 sps:$4 sm:$0xff]   ;;  %v1520_v3 = vld [vmem:[#allocation6 + $0x34] ss:$8 sps:$4 sm:$0xff]   ;;  %v1518_v4 = vld [vmem:[#allocation6 + $0x30] ss:$8 sps:$4 sm:$0xff]  }
  0x45   : > { %v1271_v7 = vld [vmem:[%s1831_s4] ss:$0 sm:$0xff] }
  0x47   : > { %1345 = vmatpush3.bf16.msra.mxu0 %v1477_v9  ;;  %1391 = vmatpush3.bf16.msra.mxu1 %v1493_v23  ;;  %v1524_v23 = vld [vmem:[#allocation6 + $0x10] ss:$8 sps:$4 sm:$0xff]  }
  0x48   : > { %1346 = vmatprep.subr.bf16.mxu0 %v1478_v10  ;;  %1392 = vmatprep.subr.bf16.mxu1 %v1494_v24 }
  0x4b   : > { %1347 = vmatpush3.bf16.msra.mxu0 %v1479_v12  ;;  %1393 = vmatpush3.bf16.msra.mxu1 %v1494_v24  ;;  %v1529_v24 = vld [vmem:[#allocation6 + $0x4] ss:$8 sps:$4 sm:$0xff]  }
  0x4c   : > { %1348 = vmatprep.subr.bf16.mxu0 %v1480_v13  ;;  %1394 = vmatprep.subr.bf16.mxu1 %v1495_v25 }
  0x4f   : > { %1349 = vmatpush3.bf16.msra.mxu0 %v1481_v16  ;;  %1395 = vmatpush3.bf16.msra.mxu1 %v1495_v25  ;;  %v1527_v25 = vld [vmem:[#allocation6] ss:$8 sps:$4 sm:$0xff]  }
  0x50   : > { %1350 = vmatprep.subr.bf16.mxu0 %v1482_v18  ;;  %1396 = vmatprep.subr.bf16.mxu1 %v1496_v26 }
  0x53   : > { %1351 = vmatpush3.bf16.msra.mxu0 %v1483_v19  ;;  %1397 = vmatpush3.bf16.msra.mxu1 %v1496_v26  ;;  %v1631_v26 = vmov 0  }
  0x54   : > { %1398 = vmatprep.subr.bf16.mxu1 %v1497_v27  ;;  %1404 = vmatprep.subr.bf16.mxu0 %v1498_v28 }
  0x56   : > { %619 = vmatmul.mubr.bf16.vlgmr.msra.gmra.mxu0 %v1484_v20  ;;  %v1523_v20 = vld [vmem:[#allocation6 + $0x24] ss:$8 sps:$4 sm:$0xff]  }
  0x57   : > { %626 = vmatprep.mubr.bf16.mxu0 %v1487_v21  ;;  %1399 = vmatpush3.bf16.msra.mxu1 %v1497_v27  ;;  %v1521_v21 = vld [vmem:[#allocation6 + $0x20] ss:$8 sps:$4 sm:$0xff]  }
  0x58   : > { %1405 = vmatpush3.bf16.msra.mxu0 %v1498_v28  ;;  %1001 = vmatprep.subr.bf16.mxu1 %v1508_v60 }
  0x59   : > { %1406 = vmatprep.subr.bf16.mxu0 %v1499_v29 }
  0x5c   : > { %1407 = vmatpush3.bf16.msra.mxu0 %v1499_v29  ;;  %v1280_v29 = vld [vmem:[%s1833_s6] ss:$0 sm:$0xff] }
  0x5d   : > { %1408 = vmatprep.subr.bf16.mxu0 %v1500_v30 }
  0x5e   : > { %627 = vmatmul.mubr.bf16.gmra.mxu0 %v1489_v22  ;;  %v1526_v22 = vld [vmem:[#allocation6 + $0x14] ss:$8 sps:$4 sm:$0xff]  }
  0x60   : > { %1409 = vmatpush3.bf16.msra.mxu0 %v1500_v30 }
  0x61   : > { %1410 = vmatprep.subr.bf16.mxu0 %v1501_v31 }
  0x64   : > { %1411 = vmatpush3.bf16.msra.mxu0 %v1501_v31 }
  0x65   : > { %1412 = vmatprep.subr.bf16.mxu0 %v1502_v32 }
  0x68   : > { %1413 = vmatpush3.bf16.msra.mxu0 %v1502_v32 }
  0x69   : > { %1414 = vmatprep.subr.bf16.mxu0 %v1503_v56 }
  0x6c   : > { %1415 = vmatpush3.bf16.msra.mxu0 %v1503_v56 }
  0x6d   : > { %1416 = vmatprep.subr.bf16.mxu0 %v1504_v57 }
  0x70   : > { %1417 = vmatpush3.bf16.msra.mxu0 %v1504_v57 }
  0x71   : > { %1418 = vmatprep.subr.bf16.mxu0 %v1505_v58 }
  0x74   : > { %1419 = vmatpush3.bf16.msra.mxu0 %v1505_v58 }
 0x116   : > { %v1352_v33 = vpop.f32.mrf.mxu0 }
 0x118   : > { %v1353_v34 = vpop.f32.mrf.mxu0 }
 0x119   : > { %v1354_v35 = vadd.f32 %v1353_v34, %v1352_v33 }
 0x11a   : > { %v1355_v36 = vpop.f32.mrf.mxu0 }
 0x11b   : > { %v621_v40 = vadd.f32 %v1354_v35, %v1250_v37 }
 0x11c   : > { %v1356_v38 = vpop.f32.mrf.mxu0 }
 0x11d   : > { %v1357_v39 = vadd.f32 %v1356_v38, %v1355_v36  ;;  %v635_v45 = vmax.f32 %v621_v40, 0.0 }
 0x11e   : > { %v1358_v41 = vpop.f32.mrf.mxu0 }
 0x11f   : > { %v624_v42 = vadd.f32 %v1357_v39, %v1250_v37 }
 0x120   : > { %v1359_v43 = vpop.f32.mrf.mxu0 }
 0x121   : > { %v1360_v44 = vadd.f32 %v1359_v43, %v1358_v41  ;;  %v636_v46 = vmax.f32 %v624_v42, 0.0  ;;  %v911_v42 = vlaneseq }
 0x122   : > { %v1361_v47 = vpop.f32.mrf.mxu0 }
 0x123   : > { %v639_v48 = vpack.c.bf16 %v636_v46, %v635_v45  ;;  %v629_v50 = vadd.f32 %v1360_v44, %v1250_v37  ;;  %v912_v43 = vshrl.u32 %v911_v42, 7  ;;  %v909_v45 = vld [vmem:[%s1835_s8] sm:$0x3] }
 0x124   : > { %v1362_v49 = vpop.f32.mrf.mxu0 }
 0x125   : > { %v1363_v51 = vadd.f32 %v1362_v49, %v1361_v47  ;;  %1400 = vmatprep.mubr.bf16.mxu1 %v639_v48  ;;  %v637_v53 = vmax.f32 %v629_v50, 0.0  ;;  %v913_v44 = vsub.s32 0, %v912_v43  ;;  %v917_v46 = vsub.s32 1, %v912_v43 }
 0x127   : > { %v632_v52 = vadd.f32 %v1363_v51, %v1250_v37  ;;  %v914_v47 = vrot.slane %v909_v45, %v913_v44  ;;  %v918_v48 = vrot.slane %v909_v45, %v917_v46 }
 0x129   : > { %v638_v54 = vmax.f32 %v632_v52, 0.0 }
 0x12b   : > { %v640_v55 = vpack.c.bf16 %v638_v54, %v637_v53 }
 0x12d   : > { %1401 = vmatmul.mubr.bf16.vlgmr.msra.gmra.mxu1 %v640_v55 }
 0x12e   : > { %1002 = vmatpush1.bf16.msra.mxu1 %v1506_v59  ;;  %1033 = vmatprep.mubr.bf16.mxu1 %v1631_v26 }
 0x12f   : > { %1003 = vmatprep.subr.bf16.mxu1 %v1511_v61 }
 0x132   : > { %1004 = vmatpush1.bf16.msra.mxu1 %v1509_v62 }
 0x133   : > { %1005 = vmatprep.subr.bf16.mxu1 %v1514_v63 }
 0x136   : > { %1006 = vmatpush1.bf16.msra.mxu1 %v1512_v0 }
 0x137   : > { %1007 = vmatprep.subr.bf16.mxu1 %v1517_v1 }
 0x13a   : > { %1008 = vmatpush1.bf16.msra.mxu1 %v1515_v2 }
 0x13b   : > { %1009 = vmatprep.subr.bf16.mxu1 %v1520_v3 }
 0x13e   : > { %1010 = vmatpush1.bf16.msra.mxu1 %v1518_v4 }
 0x13f   : > { %1011 = vmatprep.subr.bf16.mxu1 %v1523_v20 }
 0x142   : > { %1012 = vmatpush1.bf16.msra.mxu1 %v1521_v21 }
 0x143   : > { %1013 = vmatprep.subr.bf16.mxu1 %v1526_v22 }
 0x146   : > { %1014 = vmatpush1.bf16.msra.mxu1 %v1524_v23 }
 0x147   : > { %1015 = vmatprep.subr.bf16.mxu1 %v1529_v24 }
 0x14a   : > { %1016 = vmatpush1.bf16.msra.mxu1 %v1527_v25 }
 0x1ed   : > { %v1402_v5 = vpop.f32.mrf.mxu1 }
 0x1ee   : > { %v755_v11 = vadd.f32 %v1402_v5, %v1271_v7 }
 0x1ef   : > { %v746_v6 = vpop.f32.mrf.mxu1 }
 0x1f0   : > { %v747_v9 = vadd.f32 %v1271_v7, %v746_v6  ;;  %v763_v17 = vmax.f32 %v755_v11, 0.0 }
 0x1f1   : > { %v1403_v8 = vpop.f32.mrf.mxu1 }
 0x1f2   : > { %v758_v10 = vadd.f32 %v1403_v8, %v1271_v7  ;;  %v761_v15 = vmax.f32 %v747_v9, 0.0 }
 0x1f3   : > { %v749_v12 = vpop.f32.mrf.mxu1 }
 0x1f4   : > { %v750_v13 = vadd.f32 %v1271_v7, %v749_v12  ;;  %v764_v14 = vmax.f32 %v758_v10, 0.0 }
 0x1f6   : > { %v762_v16 = vmax.f32 %v750_v13, 0.0  ;;  %v766_v19 = vpack.c.bf16 %v764_v14, %v763_v17 }
 0x1f8   : > { %v765_v18 = vpack.c.bf16 %v762_v16, %v761_v15  ;;  %1335 = vst [vmem:[%s424_s29 + $0x8] sm:$0xff] %v766_v19  }
 0x1fa   : > { %1329 = vst [vmem:[%s424_s29] sm:$0xff] %v765_v18   ;;  %1420 = vmatprep.mubr.bf16.mxu0 %v765_v18 }
 0x1fb   : > { %1421 = vmatmul.mubr.bf16.vlgmr.msra.gmra.mxu0 %v766_v19 }
 0x2bb   : > { %v1422_v27 = vpop.f32.mrf.mxu0 }
 0x2bc   : > { %v881_v38 = vadd.f32 %v1422_v27, %v1280_v29 }
 0x2bd   : > { %v872_v28 = vpop.f32.mrf.mxu0 }
 0x2be   : > { %v873_v31 = vadd.f32 %v1280_v29, %v872_v28  ;;  %v889_v40 = vmax.f32 %v881_v38, 0.0 }
 0x2bf   : > { %v1423_v30 = vpop.f32.mrf.mxu0 }
 0x2c0   : > { %v887_v34 = vmax.f32 %v873_v31, 0.0  ;;  %v884_v36 = vadd.f32 %v1423_v30, %v1280_v29 }
 0x2c1   : > { %v875_v32 = vpop.f32.mrf.mxu0 }
 0x2c2   : > { %v876_v33 = vadd.f32 %v1280_v29, %v875_v32  ;;  %v890_v39 = vmax.f32 %v884_v36, 0.0 }
 0x2c4   : > { %v888_v35 = vmax.f32 %v876_v33, 0.0  ;;  %v892_v41 = vpack.c.bf16 %v890_v39, %v889_v40 }
 0x2c6   : > { %v891_v37 = vpack.c.bf16 %v888_v35, %v887_v34 }
 0x2c8   : > { %1034 = vmatmul.mubr.bf16.vlgmr.msra.gmra.mxu1 %v891_v37 }
 0x2c9   : > { %1043 = vmatprep.mubr.bf16.mxu1 %v1631_v26 }
 0x2d0   : > { %1044 = vmatmul.mubr.bf16.gmra.mxu1 %v892_v41 }
 0x388   : > { %v1035_v49 = vpop.f32.mrf.mxu1 }
 0x389   : > { %v1036_v50 = vadd.f32 %v1035_v49, %v914_v47 }
 0x38a   : > { %v1037_v51 = vpop.f32.mrf.mxu1 }
 0x38b   : > { %v1038_v52 = vadd.f32 %v1037_v51, %v918_v48  ;;  %v1054_v54 = vmax.f32 %v1036_v50, 0.0 }
 0x38c   : > { %v1039_v53 = vpop.f32.mrf.mxu1 }
 0x38d   : > { %v1055_v55 = vmax.f32 %v1038_v52, 0.0  ;;  %v1040_v56 = vadd.f32 %v1039_v53, %v914_v47 }
 0x38e   : > { %v1041_v57 = vpop.f32.mrf.mxu1 }
 0x38f   : > { %v1321_v58 = vpack.c.bf16 %v1055_v55, %v1054_v54  ;;  %v1042_v59 = vadd.f32 %v1041_v57, %v918_v48  ;;  %v1056_v61 = vmax.f32 %v1040_v56, 0.0 }
 0x390   : > { %v1045_v60 = vpop.f32.mrf.mxu1 }
 0x391   : > { %1104 = vst [vmem:[%s418_s22] sm:$0xff] %v1321_v58  ;;  %v1057_v62 = vmax.f32 %v1042_v59, 0.0  ;;  %v1046_v63 = vadd.f32 %v1045_v60, %v914_v47 }
 0x392   : > { %v1047_v0 = vpop.f32.mrf.mxu1 }
 0x393   : > { %v1322_v1 = vpack.c.bf16 %v1057_v62, %v1056_v61  ;;  %v1048_v2 = vadd.f32 %v1047_v0, %v918_v48  ;;  %v1058_v4 = vmax.f32 %v1046_v63, 0.0 }
 0x394   : > { %v1049_v3 = vpop.f32.mrf.mxu1 }
 0x395   : > { %1105 = vst [vmem:[%s418_s22 + $0x8] sm:$0xff] %v1322_v1  ;;  %v1059_v5 = vmax.f32 %v1048_v2, 0.0  ;;  %v1050_v6 = vadd.f32 %v1049_v3, %v914_v47 }
 0x396   : > { %v1051_v7 = vpop.f32.mrf.mxu1 }
 0x397   : > { %v1323_v8 = vpack.c.bf16 %v1059_v5, %v1058_v4  ;;  %v1052_v9 = vadd.f32 %v1051_v7, %v918_v48  ;;  %v1060_v10 = vmax.f32 %v1050_v6, 0.0 }
 0x399   : > { %1106 = vst [vmem:[%s418_s22 + $0x10] sm:$0xff] %v1323_v8  ;;  %v1061_v11 = vmax.f32 %v1052_v9, 0.0 }
 0x39b   : > { %v1324_v12 = vpack.c.bf16 %v1061_v11, %v1060_v10 }
 0x39d   : > { %1107 = vst [vmem:[%s418_s22 + $0x18] sm:$0xff] %v1324_v12 }
 0x39e PF: > { %s23_s13 = sadd.s32 1, %s1622_s13  }
 0x39f   : > { %p20_p2 = scmp.ge.s32.totalorder %s23_s13, 4  }
 0x3a1   :  { %22 = sbr.rel (!%p20_p2) target bundleno = 2 (0x2), region = 111 }
 0x3a6   :  { %1149 = vsyncpa [#allocation3], 1 }
 0x3a7   :  { %1151 = vsyncpa [#allocation3 + $0x1], 1 }
 0x3a8   :  { %1152 = vsyncpa [#allocation5], 1 }

</bundles_post_ra>
